<compile_context>
chip_gen: v6e
topology: v6e:2x2x1
jax: 0.10.0
libtpu: 0.0.40
codegen_flags: <defaults>
</compile_context>

<pallas_src>
import functools
import math

import jax
import jax.numpy as jnp
from jax.experimental import pallas as pl
from jax.experimental.pallas import tpu as pltpu


def _sdpa_kernel(q_ref, k_ref, v_ref, ctx_ref, attn_ref, *, scale):
    # Refs are 3-D: q (tb, tq, d_k), k (tb, Lk, d_k), v (tb, Lk, d_v).
    q = q_ref[...]
    k = k_ref[...]
    v = v_ref[...]

    # Fold the 1/sqrt(d_k) scale into q (cheaper than scaling the score matrix).
    q_scaled = q * jnp.asarray(scale, dtype=q.dtype)

    # scores = Q @ K^T, contracting the trailing d_k dims (no explicit k.T),
    # accumulated in f32 on the MXU.
    scores = jnp.einsum(
        "bqd,bkd->bqk", q_scaled, k, preferred_element_type=jnp.float32
    )

    # Numerically stable softmax over the key axis, all in f32.
    m = jnp.max(scores, axis=-1, keepdims=True)
    e = jnp.exp(scores - m)
    denom = jnp.sum(e, axis=-1, keepdims=True)
    inv = pl.reciprocal(denom)          # exact reciprocal; one per row
    attn = e * inv

    # context = attn @ V, probabilities cast to V's dtype, f32 accumulation.
    ctx = jnp.einsum(
        "bqk,bkd->bqd", attn.astype(v.dtype), v,
        preferred_element_type=jnp.float32,
    )

    ctx_ref[...] = ctx.astype(ctx_ref.dtype)
    attn_ref[...] = attn.astype(attn_ref.dtype)


def scaled_dot_product_attention(Q, K, V):
    """Pallas implementation of ScaledDotProductAttention.forward.

    Q: [B, H, Lq, d_k], K: [B, H, Lk, d_k], V: [B, H, Lk, d_v]
    Returns (context [B, H, Lq, d_v], attn [B, H, Lq, Lk]).
    """
    B, H, Lq, d_k = Q.shape
    _, _, Lk, _ = K.shape
    d_v = V.shape[-1]
    N = B * H
    scale = 1.0 / math.sqrt(d_k)
    itemsize = jnp.dtype(Q.dtype).itemsize

    # Collapse (B, H) into one leading axis (free reshape in the wrapper).
    q3 = Q.reshape(N, Lq, d_k)
    k3 = K.reshape(N, Lk, d_k)
    v3 = V.reshape(N, Lk, d_v)

    # Query tile: prefer 256 (fills v6e/v7x 256x256 MXU), fall back to 128
    # (v5e-friendly), else take the full (small) Lq.
    if Lq % 256 == 0:
        tq = 256
    elif Lq % 128 == 0:
        tq = 128
    else:
        tq = Lq

    # Heads per grid step: batch several (b, h) pairs when per-head work is
    # tiny (decode-style Lq) so tiles and DMAs are larger and per-step
    # overhead is amortized. Keep the per-step VMEM footprint small.
    tb = 1
    if Lq <= 16:
        per_head_bytes = (
            (Lk * (d_k + d_v) + tq * (d_k + d_v)) * itemsize  # k, v, q, ctx
            + tq * Lk * (4 + itemsize)                        # f32 scores + attn out
        )
        for cand in (8, 4, 2, 1):
            if N % cand == 0 and cand * per_head_bytes * 4 < (8 << 20):
                tb = cand
                break

    grid = (N // tb, Lq // tq)

    cost = pl.CostEstimate(
        flops=2 * N * Lq * Lk * (d_k + d_v),
        transcendentals=N * Lq * Lk,
        bytes_accessed=(q3.size + k3.size + v3.size) * itemsize
        + N * Lq * (d_v + Lk) * itemsize,
    )

    kernel = functools.partial(_sdpa_kernel, scale=scale)

    ctx3, attn3 = pl.pallas_call(
        kernel,
        out_shape=[
            jax.ShapeDtypeStruct((N, Lq, d_v), Q.dtype),
            jax.ShapeDtypeStruct((N, Lq, Lk), Q.dtype),
        ],
        grid_spec=pltpu.PrefetchScalarGridSpec(
            num_scalar_prefetch=0,
            grid=grid,
            in_specs=[
                pl.BlockSpec((tb, tq, d_k), lambda n, qi: (n, qi, 0)),
                pl.BlockSpec((tb, Lk, d_k), lambda n, qi: (n, 0, 0)),
                pl.BlockSpec((tb, Lk, d_v), lambda n, qi: (n, 0, 0)),
            ],
            out_specs=[
                pl.BlockSpec((tb, tq, d_v), lambda n, qi: (n, qi, 0)),
                pl.BlockSpec((tb, tq, Lk), lambda n, qi: (n, qi, 0)),
            ],
        ),
        compiler_params=pltpu.CompilerParams(
            dimension_semantics=("parallel", "parallel"),
        ),
        cost_estimate=cost,
    )(q3, k3, v3)

    context = ctx3.reshape(B, H, Lq, d_v)
    attn = attn3.reshape(B, H, Lq, Lk)
    return context, attn


def _reference(Q, K, V):
    d_k = Q.shape[-1]
    scores = jnp.einsum(
        "bhqd,bhkd->bhqk", Q, K, precision=jax.lax.Precision.HIGHEST
    ) / jnp.sqrt(jnp.float32(d_k))
    attn = jax.nn.softmax(scores, axis=-1)
    context = jnp.einsum(
        "bhqk,bhkv->bhqv", attn, V, precision=jax.lax.Precision.HIGHEST
    )
    return context, attn


if __name__ == "__main__":
    key = jax.random.PRNGKey(0)

    # Test 1: decode-style shape from the module docstring (len_q = 1).
    B, H, Lq, Lk, d_k, d_v = 2, 4, 1, 16, 32, 32
    kq, kk, kv = jax.random.split(key, 3)
    Q = jax.random.normal(kq, (B, H, Lq, d_k), dtype=jnp.float32)
    K = jax.random.normal(kk, (B, H, Lk, d_k), dtype=jnp.float32)
    V = jax.random.normal(kv, (B, H, Lk, d_v), dtype=jnp.float32)

    context, attn = scaled_dot_product_attention(Q, K, V)
    jax.block_until_ready(context)
    jax.block_until_ready(attn)

    ref_ctx, ref_attn = _reference(Q, K, V)
    assert context.shape == (B, H, Lq, d_v)
    assert attn.shape == (B, H, Lq, Lk)
    assert jnp.allclose(context, ref_ctx, atol=1e-4, rtol=1e-4)
    assert jnp.allclose(attn, ref_attn, atol=1e-4, rtol=1e-4)

    # Test 2: exercises the Lq-tiled (tq=256, tb=1) path with lane-dense tiles.
    B2, H2, Lq2, Lk2, dk2, dv2 = 1, 2, 256, 256, 64, 128
    k1, k2, k3 = jax.random.split(jax.random.PRNGKey(1), 3)
    Q2 = jax.random.normal(k1, (B2, H2, Lq2, dk2), dtype=jnp.float32)
    K2 = jax.random.normal(k2, (B2, H2, Lk2, dk2), dtype=jnp.float32)
    V2 = jax.random.normal(k3, (B2, H2, Lk2, dv2), dtype=jnp.float32)

    ctx2, attn2 = scaled_dot_product_attention(Q2, K2, V2)
    jax.block_until_ready(ctx2)
    jax.block_until_ready(attn2)

    rctx2, rattn2 = _reference(Q2, K2, V2)
    assert ctx2.shape == (B2, H2, Lq2, dv2)
    assert attn2.shape == (B2, H2, Lq2, Lk2)
    # Looser tolerance: MXU matmul precision modes may differ between the
    # in-kernel path and the XLA reference at this contraction size.
    assert jnp.allclose(ctx2, rctx2, atol=2e-2, rtol=2e-2)
    assert jnp.allclose(attn2, rattn2, atol=2e-2, rtol=2e-2)

    print("KERNEL_OK")
</pallas_src>

<mosaic_0001>
module attributes {stable_mosaic.version = 11 : i64} {
  func.func @_sdpa_kernel(%arg0: i32, %arg1: i32, %arg2: memref<8x1x32xf32, #tpu.memory_space<vmem>>, %arg3: memref<8x16x32xf32, #tpu.memory_space<vmem>>, %arg4: memref<8x16x32xf32, #tpu.memory_space<vmem>>, %arg5: memref<8x1x32xf32, #tpu.memory_space<vmem>>, %arg6: memref<8x1x16xf32, #tpu.memory_space<vmem>>) attributes {dimension_semantics = [#tpu.dimension_semantics<parallel>, #tpu.dimension_semantics<parallel>], iteration_bounds = array<i64: 1, 1>, scalar_prefetch = 0 : i64, scratch_operands = 0 : i64, tpu.core_type = #tpu.core_type<tc>, window_params = [{transform_indices = @transform_0, window_bounds = array<i64: 8, 1, 32>}, {transform_indices = @transform_1, window_bounds = array<i64: 8, 16, 32>}, {transform_indices = @transform_2, window_bounds = array<i64: 8, 16, 32>}, {transform_indices = @transform_3, window_bounds = array<i64: 8, 1, 32>}, {transform_indices = @transform_4, window_bounds = array<i64: 8, 1, 16>}]} {
    %c0 = arith.constant 0 : index
    %c0_0 = arith.constant 0 : index
    %c0_1 = arith.constant 0 : index
    %0 = vector.load %arg2[%c0, %c0_0, %c0_1] : memref<8x1x32xf32, #tpu.memory_space<vmem>>, vector<8x1x32xf32>
    %c0_2 = arith.constant 0 : index
    %c0_3 = arith.constant 0 : index
    %c0_4 = arith.constant 0 : index
    %1 = vector.load %arg3[%c0_2, %c0_3, %c0_4] : memref<8x16x32xf32, #tpu.memory_space<vmem>>, vector<8x16x32xf32>
    %c0_5 = arith.constant 0 : index
    %c0_6 = arith.constant 0 : index
    %c0_7 = arith.constant 0 : index
    %2 = vector.load %arg4[%c0_5, %c0_6, %c0_7] : memref<8x16x32xf32, #tpu.memory_space<vmem>>, vector<8x16x32xf32>
    %cst = arith.constant 0.176776692 : f32
    %3 = vector.broadcast %cst : f32 to vector<8x1x32xf32>
    %4 = arith.mulf %0, %3 : vector<8x1x32xf32>
    "tpu.trace_start"() <{level = 10 : i32, message = "bqd,bkd->bqk"}> : () -> ()
    %cst_8 = arith.constant dense<0.000000e+00> : vector<8x1x16xf32>
    %5 = tpu.matmul %4, %1, %cst_8 {dimension_numbers = #tpu.dot_dimension_numbers<[2], [2], [1], [1], [0, 0, 0, 1, 1, 1], [0], [0]>} : vector<8x1x32xf32>, vector<8x16x32xf32>, vector<8x1x16xf32> -> vector<8x1x16xf32>
    "tpu.trace_stop"() : () -> ()
    %cst_9 = arith.constant dense<0xFF800000> : vector<8x1xf32>
    %6 = vector.multi_reduction <maximumf>, %5, %cst_9 [2] : vector<8x1x16xf32> to vector<8x1xf32>
    %7 = vector.shape_cast %6 : vector<8x1xf32> to vector<8x1x1xf32>
    %8 = vector.broadcast %7 : vector<8x1x1xf32> to vector<8x1x16xf32>
    %9 = arith.subf %5, %8 : vector<8x1x16xf32>
    %10 = math.exp %9 : vector<8x1x16xf32>
    %cst_10 = arith.constant dense<0.000000e+00> : vector<8x1xf32>
    %11 = vector.multi_reduction <add>, %10, %cst_10 [2] : vector<8x1x16xf32> to vector<8x1xf32>
    %12 = vector.shape_cast %11 : vector<8x1xf32> to vector<8x1x1xf32>
    %13 = tpu.reciprocal %12 : vector<8x1x1xf32> -> vector<8x1x1xf32>
    %14 = vector.broadcast %13 : vector<8x1x1xf32> to vector<8x1x16xf32>
    %15 = arith.mulf %10, %14 : vector<8x1x16xf32>
    "tpu.trace_start"() <{level = 10 : i32, message = "bqk,bkd->bqd"}> : () -> ()
    %cst_11 = arith.constant dense<0.000000e+00> : vector<8x1x32xf32>
    %16 = tpu.matmul %15, %2, %cst_11 {dimension_numbers = #tpu.dot_dimension_numbers<[2], [1], [1], [2], [0, 0, 0, 1, 1, 2], [0], [0]>} : vector<8x1x16xf32>, vector<8x16x32xf32>, vector<8x1x32xf32> -> vector<8x1x32xf32>
    "tpu.trace_stop"() : () -> ()
    %c0_12 = arith.constant 0 : index
    %c0_13 = arith.constant 0 : index
    %c0_14 = arith.constant 0 : index
    %17 = vector.load %arg5[%c0_12, %c0_13, %c0_14] : memref<8x1x32xf32, #tpu.memory_space<vmem>>, vector<8x1x32xf32>
    tpu.vector_store %arg5[%c0_12, %c0_13, %c0_14], %16 {strides = array<i32>} : memref<8x1x32xf32, #tpu.memory_space<vmem>>, vector<8x1x32xf32>,
    %c0_15 = arith.constant 0 : index
    %c0_16 = arith.constant 0 : index
    %c0_17 = arith.constant 0 : index
    %18 = vector.load %arg6[%c0_15, %c0_16, %c0_17] : memref<8x1x16xf32, #tpu.memory_space<vmem>>, vector<8x1x16xf32>
    tpu.vector_store %arg6[%c0_15, %c0_16, %c0_17], %15 {strides = array<i32>} : memref<8x1x16xf32, #tpu.memory_space<vmem>>, vector<8x1x16xf32>,
    return
  }
  func.func @transform_0(%arg0: i32, %arg1: i32) -> (i32, i32, i32) {
    %c0_i32 = arith.constant 0 : i32
    %c0_i32_0 = arith.constant 0 : i32
    return %arg0, %arg1, %c0_i32 : i32, i32, i32
  }
  func.func @transform_1(%arg0: i32, %arg1: i32) -> (i32, i32, i32) {
    %c0_i32 = arith.constant 0 : i32
    %c0_i32_0 = arith.constant 0 : i32
    %c0_i32_1 = arith.constant 0 : i32
    return %arg0, %c0_i32, %c0_i32_0 : i32, i32, i32
  }
  func.func @transform_2(%arg0: i32, %arg1: i32) -> (i32, i32, i32) {
    %c0_i32 = arith.constant 0 : i32
    %c0_i32_0 = arith.constant 0 : i32
    %c0_i32_1 = arith.constant 0 : i32
    return %arg0, %c0_i32, %c0_i32_0 : i32, i32, i32
  }
  func.func @transform_3(%arg0: i32, %arg1: i32) -> (i32, i32, i32) {
    %c0_i32 = arith.constant 0 : i32
    %c0_i32_0 = arith.constant 0 : i32
    return %arg0, %arg1, %c0_i32 : i32, i32, i32
  }
  func.func @transform_4(%arg0: i32, %arg1: i32) -> (i32, i32, i32) {
    %c0_i32 = arith.constant 0 : i32
    %c0_i32_0 = arith.constant 0 : i32
    return %arg0, %arg1, %c0_i32 : i32, i32, i32
  }
}

</mosaic_0001>

<bundles_post_ra>
// kernel: tpu_custom_call.1
= control target key start
LH: loop header
LB: loop body
LE: loop exit
PB: predicated region body
PF: predicated region fallthrough
CT: control target
= control target key end

     0   :  { %10 = vsyncpa [#allocation3], 0  ;;  %s2024_s0 = inlined_call_operand.hbm [shape: f32[8,1,32], index: 0, kind: input, shape index: {}]   ;;  %s2025_s1 = inlined_call_operand.hbm [shape: f32[8,16,32], index: 1, kind: input, shape index: {}]   ;;  %s2026_s2 = inlined_call_operand.hbm [shape: f32[8,16,32], index: 2, kind: input, shape index: {}]   ;;  %s2027_s3 = inlined_call_operand.hbm [shape: f32[8,1,32], index: 3, kind: output, shape index: {0}]   ;;  %s2028_s4 = inlined_call_operand.hbm [shape: f32[8,1,16], index: 4, kind: output, shape index: {1}]  }
   0x1   :  { %11 = vsyncpa [#allocation6], 0 }
   0x2   :  { %12 = vsyncpa [#allocation4], 0 }
   0x3   :  { %13 = vsyncpa [#allocation10], 0  ;;  %s1808_s15 = smov [#allocation5]  }
   0x4   :  { %s31_s16 = sshll.u32 %s1808_s15, 4  ;;  %s32_s16 = int_to_ptr.vmem [resolvable:$true] %s31_s16 }
   0x5   :  { %s1708_s17 = scalar_lea.vmem %s32_s16, 2048  ;;  %p1713_p1 = scmp.lt.s32.totalorder %s32_s16, %s32_s16 }
   0x6   :  { %p1709_p0 = scmp.ne.s32.totalorder %s32_s16, %s1708_s17  ;;  %p1714_p2 = scmp.lt.s32.totalorder %s1708_s17, %s1708_s17 }
   0x8   :  { %p1715_p3 = por %p1714_p2, %p1713_p1 }
   0xa   :  { %p1716_p4 = pnand %p1715_p3, %p1709_p0 }
   0xc   :  { %1719 = shalt.err (!%p1716_p4)
}
   0xd   :  { %s1809_s18 = smov 128   ;;  %s1810_s19 = smov 8  }
   0xe   :  { %37 = dma.hbm_to_vmem [thread:$0]  %s2025_s1, 2048, %s32_s16, [#allocation6], %s1809_s18, %s1809_s18, %s1810_s19  }
   0xf   :  { %s1811_s22 = smov [#allocation2]  }
  0x10   :  { %s19_s23 = sshll.u32 %s1811_s22, 4  ;;  %s20_s23 = int_to_ptr.vmem [resolvable:$true] %s19_s23 }
  0x11   :  { %s1728_s24 = scalar_lea.vmem %s20_s23, 128  ;;  %p1733_p6 = scmp.lt.s32.totalorder %s20_s23, %s20_s23 }
  0x12   :  { %p1729_p5 = scmp.ne.s32.totalorder %s20_s23, %s1728_s24  ;;  %p1734_p7 = scmp.lt.s32.totalorder %s1728_s24, %s1728_s24 }
  0x14   :  { %p1735_p8 = por %p1734_p7, %p1733_p6 }
  0x16   :  { %p1736_p9 = pnand %p1735_p8, %p1729_p5 }
  0x18   :  { %1739 = shalt.err (!%p1736_p9)
}
  0x19   :  { %s1812_s25 = smov 16   ;;  %s1813_s26 = smov 1  }
  0x1a   :  { %25 = dma.hbm_to_vmem [thread:$0]  %s2024_s0, 128, %s20_s23, [#allocation3], %s1812_s25, %s1812_s25, %s1813_s26  }
  0x1b   :  { %s1814_s1 = smov [#allocation7]  }
  0x1c   :  { %s43_s29 = sshll.u32 %s1814_s1, 4  ;;  %s44_s29 = int_to_ptr.vmem [resolvable:$true] %s43_s29 }
  0x1d   :  { %s1748_s30 = scalar_lea.vmem %s44_s29, 2048  ;;  %p1753_p11 = scmp.lt.s32.totalorder %s44_s29, %s44_s29 }
  0x1e   :  { %p1749_p10 = scmp.ne.s32.totalorder %s44_s29, %s1748_s30  ;;  %p1754_p12 = scmp.lt.s32.totalorder %s1748_s30, %s1748_s30 }
  0x20   :  { %p1755_p13 = por %p1754_p12, %p1753_p11 }
  0x22   :  { %p1756_p0 = pnand %p1755_p13, %p1749_p10 }
  0x24   :  { %1759 = shalt.err (!%p1756_p0)
}
  0x25   :  { %49 = dma.hbm_to_vmem [thread:$0]  %s2026_s2, 2048, %s44_s29, [#allocation6], %s1809_s18, %s1809_s18, %s1810_s19  }
  0x26   :  { %1800 = dma.done.wait [#allocation3], 128  }
  0x27   :  { %1801 = vsyncadd [#allocation3], 4294967168 }
  0x28   :  { %1802 = dma.done.wait [#allocation6], 4096  }
  0x29   :  { %1803 = vsyncadd [#allocation6], 4294963200  ;;  %v1815_v0 = vmov 0.0   ;;  %vm1816_vm0 = vmmov 0   ;;  %vm107_vm1 = vcmask 261120   ;;  %v68_v1 = vld [vmem:[#allocation5 + $0x8] sm:$0xff] }
  0x2a   :  { %1545 = vmatprep.subr.mxu0 %v1815_v0  ;;  %1552 = vmatprep.subr.mxu1 %v1815_v0  ;;  %v70_v2 = vld [vmem:[#allocation5 + $0x18] sm:$0xff]  ;;  %v67_v5 = vld [vmem:[#allocation5] sm:$0xff]  ;;  %v69_v6 = vld [vmem:[#allocation5 + $0x10] sm:$0xff]  ;;  %vm740_vm2 = vcmask 122880   ;;  %vm829_vm3 = vcmask 130048   ;;  %s1817_s0 = smov [#allocation9]  }
  0x2b   :  { %1549 = vmatprep.mubr.msk.f32.mxu0 %vm1816_vm0, %v1815_v0  ;;  %1556 = vmatprep.mubr.msk.f32.mxu1 %vm1816_vm0, %v1815_v0  ;;  %v59_v3 = vld [vmem:[#allocation2] sm:$0x1]  ;;  %v60_v4 = vld [vmem:[#allocation2 + $0x1] sm:$0x1]  ;;  %v72_v9 = vld [vmem:[#allocation5 + $0x28] sm:$0xff]  ;;  %s1448_s2 = sshll.u32 %s1817_s0, 4  ;;  %s1449_s2 = int_to_ptr.vmem [resolvable:$true] %s1448_s2 }
  0x2c   :  { %1546 = vmatpush3.xpose.msk.msra.mxu0 %vm107_vm1, %v68_v1  ;;  %1553 = vmatpush3.xpose.msk.msra.mxu1 %vm107_vm1, %v70_v2  ;;  %v99_v7 = vmul.f32 0.17677669, %v59_v3  ;;  %v100_v8 = vmul.f32 0.17677669, %v60_v4  ;;  %v74_v10 = vld [vmem:[#allocation5 + $0x38] sm:$0xff]  ;;  %v71_v13 = vld [vmem:[#allocation5 + $0x20] sm:$0xff]  ;;  %p1765_p2 = scmp.lt.s32.totalorder %s1449_s2, %s1449_s2 }
  0x2d   :  { %1547 = vmatprep.subr.mxu0 %v1815_v0  ;;  %1554 = vmatprep.subr.mxu1 %v1815_v0  ;;  %v61_v11 = vld [vmem:[#allocation2 + $0x2] sm:$0x1]  ;;  %v62_v12 = vld [vmem:[#allocation2 + $0x3] sm:$0x1]  ;;  %v73_v14 = vld [vmem:[#allocation5 + $0x30] sm:$0xff]  ;;  %s1760_s7 = scalar_lea.vmem %s1449_s2, 128 }
  0x2e   :  { %v101_v15 = vmul.f32 0.17677669, %v61_v11  ;;  %v102_v16 = vmul.f32 0.17677669, %v62_v12  ;;  %v76_v17 = vld [vmem:[#allocation5 + $0x48] sm:$0xff]  ;;  %v78_v18 = vld [vmem:[#allocation5 + $0x58] sm:$0xff]  ;;  %p1761_p1 = scmp.ne.s32.totalorder %s1449_s2, %s1760_s7  ;;  %p1766_p3 = scmp.lt.s32.totalorder %s1760_s7, %s1760_s7 }
  0x2f   :  { %v63_v19 = vld [vmem:[#allocation2 + $0x4] sm:$0x1]  ;;  %v64_v20 = vld [vmem:[#allocation2 + $0x5] sm:$0x1]  ;;  %v75_v21 = vld [vmem:[#allocation5 + $0x40] sm:$0xff] }
  0x30   :  { %1548 = vmatpush3.xpose.msk.msra.mxu0 %vm107_vm1, %v67_v5  ;;  %1555 = vmatpush3.xpose.msk.msra.mxu1 %vm107_vm1, %v69_v6  ;;  %v77_v22 = vld [vmem:[#allocation5 + $0x50] sm:$0xff]  ;;  %v103_v23 = vmul.f32 0.17677669, %v63_v19  ;;  %v104_v24 = vmul.f32 0.17677669, %v64_v20  ;;  %v80_v25 = vld [vmem:[#allocation5 + $0x68] sm:$0xff]  ;;  %p1767_p4 = por %p1766_p3, %p1765_p2 }
  0x31   :  { %1559 = vmatprep.subr.mxu0 %v1815_v0  ;;  %1566 = vmatprep.subr.mxu1 %v1815_v0  ;;  %v82_v26 = vld [vmem:[#allocation5 + $0x78] sm:$0xff]  ;;  %v79_v29 = vld [vmem:[#allocation5 + $0x60] sm:$0xff]  ;;  %v81_v30 = vld [vmem:[#allocation5 + $0x70] sm:$0xff] }
  0x32   :  { %v65_v27 = vld [vmem:[#allocation2 + $0x6] sm:$0x1]  ;;  %v66_v28 = vld [vmem:[#allocation2 + $0x7] sm:$0x1]  ;;  %p1768_p5 = pnand %p1767_p4, %p1761_p1 }
  0x33   :  { %1550 = vmatmul.mubr.msk.f32.vlgmr.msra.gmra.mxu0 %vm107_vm1, %v99_v7  ;;  %1557 = vmatmul.mubr.msk.f32.vlgmr.msra.gmra.mxu1 %vm107_vm1, %v100_v8  ;;  %v105_v31 = vmul.f32 0.17677669, %v65_v27  ;;  %v106_v32 = vmul.f32 0.17677669, %v66_v28 }
  0x34   :  { %1560 = vmatpush3.xpose.msk.msra.mxu0 %vm107_vm1, %v72_v9  ;;  %1567 = vmatpush3.xpose.msk.msra.mxu1 %vm107_vm1, %v74_v10 }
  0x35   :  { %1561 = vmatprep.subr.mxu0 %v1815_v0  ;;  %1568 = vmatprep.subr.mxu1 %v1815_v0 }
  0x36   :  { %1563 = vmatprep.mubr.msk.f32.mxu0 %vm1816_vm0, %v1815_v0  ;;  %1570 = vmatprep.mubr.msk.f32.mxu1 %vm1816_vm0, %v1815_v0 }
  0x38   :  { %1562 = vmatpush3.xpose.msk.msra.mxu0 %vm107_vm1, %v71_v13  ;;  %1569 = vmatpush3.xpose.msk.msra.mxu1 %vm107_vm1, %v73_v14 }
  0x39   :  { %1573 = vmatprep.subr.mxu0 %v1815_v0  ;;  %1580 = vmatprep.subr.mxu1 %v1815_v0 }
  0x3b   :  { %1564 = vmatmul.mubr.msk.f32.vlgmr.msra.gmra.mxu0 %vm107_vm1, %v101_v15  ;;  %1571 = vmatmul.mubr.msk.f32.vlgmr.msra.gmra.mxu1 %vm107_vm1, %v102_v16 }
  0x3c   :  { %1574 = vmatpush3.xpose.msk.msra.mxu0 %vm107_vm1, %v76_v17  ;;  %1581 = vmatpush3.xpose.msk.msra.mxu1 %vm107_vm1, %v78_v18 }
  0x3d   :  { %1575 = vmatprep.subr.mxu0 %v1815_v0  ;;  %1582 = vmatprep.subr.mxu1 %v1815_v0 }
  0x3e   :  { %1577 = vmatprep.mubr.msk.f32.mxu0 %vm1816_vm0, %v1815_v0  ;;  %1584 = vmatprep.mubr.msk.f32.mxu1 %vm1816_vm0, %v1815_v0 }
  0x40   :  { %1576 = vmatpush3.xpose.msk.msra.mxu0 %vm107_vm1, %v75_v21  ;;  %1583 = vmatpush3.xpose.msk.msra.mxu1 %vm107_vm1, %v77_v22 }
  0x41   :  { %1587 = vmatprep.subr.mxu0 %v1815_v0  ;;  %1594 = vmatprep.subr.mxu1 %v1815_v0 }
  0x43   :  { %1578 = vmatmul.mubr.msk.f32.vlgmr.msra.gmra.mxu0 %vm107_vm1, %v103_v23  ;;  %1585 = vmatmul.mubr.msk.f32.vlgmr.msra.gmra.mxu1 %vm107_vm1, %v104_v24 }
  0x44   :  { %1588 = vmatpush3.xpose.msk.msra.mxu0 %vm107_vm1, %v80_v25  ;;  %1595 = vmatpush3.xpose.msk.msra.mxu1 %vm107_vm1, %v82_v26 }
  0x45   :  { %1589 = vmatprep.subr.mxu0 %v1815_v0  ;;  %1596 = vmatprep.subr.mxu1 %v1815_v0 }
  0x46   :  { %1591 = vmatprep.mubr.msk.f32.mxu0 %vm1816_vm0, %v1815_v0  ;;  %1598 = vmatprep.mubr.msk.f32.mxu1 %vm1816_vm0, %v1815_v0 }
  0x48   :  { %1590 = vmatpush3.xpose.msk.msra.mxu0 %vm107_vm1, %v79_v29  ;;  %1597 = vmatpush3.xpose.msk.msra.mxu1 %vm107_vm1, %v81_v30 }
  0x49   :  { %1601 = vmatprep.subr.mxu0 %v1815_v0  ;;  %1608 = vmatprep.subr.mxu1 %v1815_v0 }
  0x4b   :  { %1592 = vmatmul.mubr.msk.f32.vlgmr.msra.gmra.mxu0 %vm107_vm1, %v105_v31  ;;  %1599 = vmatmul.mubr.msk.f32.vlgmr.msra.gmra.mxu1 %vm107_vm1, %v106_v32  ;;  %v84_v31 = vld [vmem:[#allocation7 + $0x8] sm:$0xff]  ;;  %v83_v32 = vld [vmem:[#allocation7] sm:$0xff] }
  0x4c   :  { %1605 = vmatprep.mubr.msk.f32.mxu0 %vm1816_vm0, %v1815_v0  ;;  %1612 = vmatprep.mubr.msk.f32.mxu1 %vm1816_vm0, %v1815_v0 }
  0x4d   :  { %1602 = vmatpush3.msra.mxu0 %v84_v31 }
  0x4e   :  { %1603 = vmatprep.subr.mxu0 %v1815_v0 }
  0x4f   :  { %1604 = vmatpush3.msra.mxu0 %v83_v32 }
  0x50   :  { %1615 = vmatprep.subr.mxu0 %v1815_v0 }
  0xf3   :  { %v183_v33 = vpop.f32.mrf.mxu0  ;;  %v262_v34 = vpop.f32.mrf.mxu1 }
  0xf4   :  { %v741_v35 = vsel %vm740_vm2, %v183_v33, -inf  ;;  %v744_v38 = vsel %vm740_vm2, %v262_v34, -inf }
  0xf5   :  { %v1558_v36 = vpop.f32.mrf.mxu1  ;;  %742 = vmax.xlane.f32.xlu0 %v741_v35  ;;  %v1551_v37 = vpop.f32.mrf.mxu0 }
  0xf6   :  { %v86_v36 = vld [vmem:[#allocation7 + $0x18] sm:$0xff]  ;;  %v85_v37 = vld [vmem:[#allocation7 + $0x10] sm:$0xff] }
  0xf7   :  { %1609 = vmatpush3.msra.mxu1 %v86_v36 }
  0xf8   :  { %1610 = vmatprep.subr.mxu1 %v1815_v0 }
  0xf9   :  { %745 = vmax.xlane.f32.xlu0 %v744_v38  ;;  %1611 = vmatpush3.msra.mxu1 %v85_v37 }
  0xfa   :  { %1622 = vmatprep.subr.mxu1 %v1815_v0 }
  0xfb   :  { %v341_v39 = vpop.f32.mrf.mxu0  ;;  %v420_v40 = vpop.f32.mrf.mxu1 }
  0xfc   :  { %v747_v41 = vsel %vm740_vm2, %v341_v39, -inf  ;;  %v750_v44 = vsel %vm740_vm2, %v420_v40, -inf }
  0xfd   :  { %v1572_v42 = vpop.f32.mrf.mxu1  ;;  %748 = vmax.xlane.f32.xlu1 %v747_v41  ;;  %v1565_v43 = vpop.f32.mrf.mxu0 }
 0x101   :  { %751 = vmax.xlane.f32.xlu1 %v750_v44  ;;  %v88_v44 = vld [vmem:[#allocation7 + $0x28] sm:$0xff] }
 0x103   :  { %v499_v45 = vpop.f32.mrf.mxu0  ;;  %v578_v46 = vpop.f32.mrf.mxu1 }
 0x104   :  { %v756_v47 = vsel %vm740_vm2, %v578_v46, -inf  ;;  %v753_v48 = vsel %vm740_vm2, %v499_v45, -inf }
 0x105   :  { %v1586_v49 = vpop.f32.mrf.mxu1  ;;  %757 = vmax.xlane.f32.xlu1 %v756_v47  ;;  %754 = vmax.xlane.f32.xlu0 %v753_v48  ;;  %v1579_v50 = vpop.f32.mrf.mxu0  ;;  %v87_v47 = vld [vmem:[#allocation7 + $0x20] sm:$0xff] }
 0x106   :  { %v90_v50 = vld [vmem:[#allocation7 + $0x38] sm:$0xff] }
 0x10b   :  { %v657_v51 = vpop.f32.mrf.mxu0  ;;  %v736_v52 = vpop.f32.mrf.mxu1 }
 0x10c   :  { %v762_v53 = vsel %vm740_vm2, %v736_v52, -inf  ;;  %v759_v54 = vsel %vm740_vm2, %v657_v51, -inf }
 0x10d   :  { %v1600_v55 = vpop.f32.mrf.mxu1  ;;  %763 = vmax.xlane.f32.xlu1 %v762_v53  ;;  %760 = vmax.xlane.f32.xlu0 %v759_v54  ;;  %v1593_v56 = vpop.f32.mrf.mxu0  ;;  %v92_v54 = vld [vmem:[#allocation7 + $0x48] sm:$0xff] }
 0x17e   :  { %v743_v57 = vpop.xlane.xlu0 %742 }
 0x17f   :  { %v765_v58 = vsub.f32 %v183_v33, %v743_v57  ;;  %v91_v57 = vld [vmem:[#allocation7 + $0x40] sm:$0xff] }
 0x181   :  { %v773_v59 = vmul.f32 1.442695, %v765_v58 }
 0x182   :  { %v746_v60 = vpop.xlane.xlu0 %745 }
 0x183   :  { %1668 = vpow2.f32 %v773_v59  ;;  %v766_v61 = vsub.f32 %v262_v34, %v746_v60  ;;  %v94_v60 = vld [vmem:[#allocation7 + $0x58] sm:$0xff] }
 0x185   :  { %v775_v62 = vmul.f32 1.442695, %v766_v61  ;;  %v93_v61 = vld [vmem:[#allocation7 + $0x50] sm:$0xff] }
 0x186   :  { %v749_v63 = vpop.xlane.xlu1 %748 }
 0x187   :  { %1670 = vpow2.f32 %v775_v62  ;;  %v767_v1 = vsub.f32 %v341_v39, %v749_v63 }
 0x189   :  { %v777_v2 = vmul.f32 1.442695, %v767_v1 }
 0x18a   :  { %v752_v3 = vpop.xlane.xlu1 %751 }
 0x18b   :  { %1672 = vpow2.f32 %v777_v2  ;;  %v768_v4 = vsub.f32 %v420_v40, %v752_v3  ;;  %v98_v2 = vld [vmem:[#allocation7 + $0x78] sm:$0xff] }
 0x18d   :  { %v779_v5 = vmul.f32 1.442695, %v768_v4  ;;  %v96_v4 = vld [vmem:[#allocation7 + $0x68] sm:$0xff] }
 0x18e   :  { %v758_v6 = vpop.xlane.xlu1 %757  ;;  %v755_v7 = vpop.xlane.xlu0 %754 }
 0x18f   :  { %1674 = vpow2.f32 %v779_v5  ;;  %v770_v8 = vsub.f32 %v578_v46, %v758_v6  ;;  %v769_v9 = vsub.f32 %v499_v45, %v755_v7  ;;  %v97_v5 = vld [vmem:[#allocation7 + $0x70] sm:$0xff]  ;;  %v95_v6 = vld [vmem:[#allocation7 + $0x60] sm:$0xff] }
 0x190   :  { %v1669_v10 = vpop.eup %1668 }
 0x191   :  { %v783_v11 = vmul.f32 1.442695, %v770_v8  ;;  %v781_v12 = vmul.f32 1.442695, %v769_v9  ;;  %v789_v13 = vsel %vm740_vm2, %v1669_v10, 0.0 }
 0x192   :  { %790 = vadd.xlane.f32.xlu0 %v789_v13 }
 0x193   :  { %1676 = vpow2.f32 %v783_v11 }
 0x194   :  { %v1927_v14 = vpop.eup %1670  ;;  %1678 = vpow2.f32 %v781_v12 }
 0x195   :  { %v792_v15 = vsel %vm740_vm2, %v1927_v14, 0.0 }
 0x196   :  { %793 = vadd.xlane.f32.xlu1 %v792_v15  ;;  %v764_v16 = vpop.xlane.xlu1 %763  ;;  %v761_v17 = vpop.xlane.xlu0 %760 }
 0x197   :  { %v772_v18 = vsub.f32 %v736_v52, %v764_v16  ;;  %v771_v19 = vsub.f32 %v657_v51, %v761_v17  ;;  %v89_v51 = vld [vmem:[#allocation7 + $0x30] sm:$0xff] }
 0x198   :  { %v1931_v20 = vpop.eup %1672 }
 0x199   :  { %v787_v21 = vmul.f32 1.442695, %v772_v18  ;;  %v785_v22 = vmul.f32 1.442695, %v771_v19  ;;  %v795_v23 = vsel %vm740_vm2, %v1931_v20, 0.0 }
 0x19a   :  { %796 = vadd.xlane.f32.xlu0 %v795_v23 }
 0x19b   :  { %1680 = vpow2.f32 %v787_v21 }
 0x19c   :  { %v1935_v24 = vpop.eup %1674  ;;  %1682 = vpow2.f32 %v785_v22 }
 0x19d   :  { %v798_v25 = vsel %vm740_vm2, %v1935_v24, 0.0 }
 0x19e   :  { %799 = vadd.xlane.f32.xlu1 %v798_v25 }
 0x1a0   :  { %v1939_v26 = vpop.eup %1676 }
 0x1a1   :  { %v1941_v27 = vpop.eup %1678  ;;  %v804_v28 = vsel %vm740_vm2, %v1939_v26, 0.0 }
 0x1a2   :  { %805 = vadd.xlane.f32.xlu1 %v804_v28  ;;  %v801_v29 = vsel %vm740_vm2, %v1941_v27, 0.0 }
 0x1a3   :  { %802 = vadd.xlane.f32.xlu0 %v801_v29 }
 0x1a8   :  { %v1947_v30 = vpop.eup %1680 }
 0x1a9   :  { %v1949_v33 = vpop.eup %1682  ;;  %v810_v34 = vsel %vm740_vm2, %v1947_v30, 0.0 }
 0x1aa   :  { %811 = vadd.xlane.f32.xlu1 %v810_v34  ;;  %v807_v35 = vsel %vm740_vm2, %v1949_v33, 0.0 }
 0x1ab   :  { %808 = vadd.xlane.f32.xlu0 %v807_v35 }
 0x21b   :  { %v791_v38 = vpop.xlane.xlu0 %790 }
 0x21c   :  { %1684 = vrcp.f32 %v791_v38 }
 0x21f   :  { %v794_v39 = vpop.xlane.xlu1 %793 }
 0x220   :  { %1686 = vrcp.f32 %v794_v39 }
 0x223   :  { %v797_v40 = vpop.xlane.xlu0 %796 }
 0x224   :  { %1688 = vrcp.f32 %v797_v40 }
 0x227   :  { %v800_v41 = vpop.xlane.xlu1 %799 }
 0x228   :  { %1690 = vrcp.f32 %v800_v41 }
 0x229   :  { %v1685_v42 = vpop.eup %1684 }
 0x22a   :  { %v821_v43 = vmul.f32 %v1685_v42, %v1669_v10 }
 0x22b   :  { %v806_v45 = vpop.xlane.xlu1 %805 }
 0x22c   :  { %1692 = vrcp.f32 %v806_v45  ;;  %v803_v46 = vpop.xlane.xlu0 %802  ;;  %1606 = vmatmul.mubr.msk.f32.vlgmr.msra.gmra.mxu0 %vm829_vm3, %v821_v43  ;;  %1423 = vst.msk [vmem:[#allocation9] sm:$0x1] %vm740_vm2, %v821_v43 }
 0x22d   :  { %v1687_v48 = vpop.eup %1686  ;;  %1694 = vrcp.f32 %v803_v46  ;;  %1616 = vmatpush3.msra.mxu0 %v88_v44  ;;  %1619 = vmatprep.mubr.msk.f32.mxu0 %vm1816_vm0, %v1815_v0 }
 0x22e   :  { %v822_v49 = vmul.f32 %v1687_v48, %v1927_v14  ;;  %1617 = vmatprep.subr.mxu0 %v1815_v0 }
 0x22f   :  { %1618 = vmatpush3.msra.mxu0 %v87_v47 }
 0x230   :  { %1613 = vmatmul.mubr.msk.f32.vlgmr.msra.gmra.mxu1 %vm829_vm3, %v822_v49  ;;  %1424 = vst.msk [vmem:[#allocation9 + $0x1] sm:$0x1] %vm740_vm2, %v822_v49  ;;  %1629 = vmatprep.subr.mxu0 %v1815_v0 }
 0x231   :  { %v1689_v52 = vpop.eup %1688  ;;  %1623 = vmatpush3.msra.mxu1 %v90_v50  ;;  %1626 = vmatprep.mubr.msk.f32.mxu1 %vm1816_vm0, %v1815_v0 }
 0x232   :  { %v823_v53 = vmul.f32 %v1689_v52, %v1931_v20  ;;  %1624 = vmatprep.subr.mxu1 %v1815_v0 }
 0x233   :  { %v812_v55 = vpop.xlane.xlu1 %811  ;;  %1625 = vmatpush3.msra.mxu1 %v89_v51 }
 0x234   :  { %1696 = vrcp.f32 %v812_v55  ;;  %v809_v56 = vpop.xlane.xlu0 %808  ;;  %1620 = vmatmul.mubr.msk.f32.vlgmr.msra.gmra.mxu0 %vm829_vm3, %v823_v53  ;;  %1425 = vst.msk [vmem:[#allocation9 + $0x2] sm:$0x1] %vm740_vm2, %v823_v53  ;;  %1636 = vmatprep.subr.mxu1 %v1815_v0 }
 0x235   :  { %v1691_v58 = vpop.eup %1690  ;;  %1698 = vrcp.f32 %v809_v56  ;;  %1630 = vmatpush3.msra.mxu0 %v92_v54  ;;  %1633 = vmatprep.mubr.msk.f32.mxu0 %vm1816_vm0, %v1815_v0 }
 0x236   :  { %v824_v59 = vmul.f32 %v1691_v58, %v1935_v24  ;;  %1631 = vmatprep.subr.mxu0 %v1815_v0 }
 0x237   :  { %1632 = vmatpush3.msra.mxu0 %v91_v57 }
 0x238   :  { %1627 = vmatmul.mubr.msk.f32.vlgmr.msra.gmra.mxu1 %vm829_vm3, %v824_v59  ;;  %1426 = vst.msk [vmem:[#allocation9 + $0x3] sm:$0x1] %vm740_vm2, %v824_v59  ;;  %1643 = vmatprep.subr.mxu0 %v1815_v0 }
 0x239   :  { %v1693_v62 = vpop.eup %1692  ;;  %1637 = vmatpush3.msra.mxu1 %v94_v60  ;;  %1640 = vmatprep.mubr.msk.f32.mxu1 %vm1816_vm0, %v1815_v0 }
 0x23a   :  { %v1695_v63 = vpop.eup %1694  ;;  %1638 = vmatprep.subr.mxu1 %v1815_v0  ;;  %v826_v1 = vmul.f32 %v1693_v62, %v1939_v26 }
 0x23b   :  { %1639 = vmatpush3.msra.mxu1 %v93_v61  ;;  %v825_v3 = vmul.f32 %v1695_v63, %v1941_v27 }
 0x23c   :  { %1641 = vmatmul.mubr.msk.f32.vlgmr.msra.gmra.mxu1 %vm829_vm3, %v826_v1  ;;  %1428 = vst.msk [vmem:[#allocation9 + $0x5] sm:$0x1] %vm740_vm2, %v826_v1  ;;  %1650 = vmatprep.subr.mxu1 %v1815_v0 }
 0x23d   :  { %1634 = vmatmul.mubr.msk.f32.vlgmr.msra.gmra.mxu0 %vm829_vm3, %v825_v3  ;;  %1427 = vst.msk [vmem:[#allocation9 + $0x4] sm:$0x1] %vm740_vm2, %v825_v3  ;;  %1651 = vmatpush3.msra.mxu1 %v98_v2 }
 0x23e   :  { %1644 = vmatpush3.msra.mxu0 %v96_v4  ;;  %1652 = vmatprep.subr.mxu1 %v1815_v0 }
 0x23f   :  { %1645 = vmatprep.subr.mxu0 %v1815_v0  ;;  %1653 = vmatpush3.msra.mxu1 %v97_v5 }
 0x240   :  { %1646 = vmatpush3.msra.mxu0 %v95_v6  ;;  %1647 = vmatprep.mubr.msk.f32.mxu0 %vm1816_vm0, %v1815_v0 }
 0x241   :  { %v1697_v7 = vpop.eup %1696  ;;  %1654 = vmatprep.mubr.msk.f32.mxu1 %vm1816_vm0, %v1815_v0 }
 0x242   :  { %v1699_v8 = vpop.eup %1698  ;;  %v828_v9 = vmul.f32 %v1697_v7, %v1947_v30 }
 0x243   :  { %v827_v10 = vmul.f32 %v1699_v8, %v1949_v33 }
 0x244   :  { %1655 = vmatmul.mubr.msk.f32.vlgmr.msra.gmra.mxu1 %vm829_vm3, %v828_v9  ;;  %1430 = vst.msk [vmem:[#allocation9 + $0x7] sm:$0x1] %vm740_vm2, %v828_v9 }
 0x245   :  { %1648 = vmatmul.mubr.msk.f32.vlgmr.msra.gmra.mxu0 %vm829_vm3, %v827_v10  ;;  %1429 = vst.msk [vmem:[#allocation9 + $0x6] sm:$0x1] %vm740_vm2, %v827_v10 }
 0x246   :  { %1771 = shalt.err (!%p1768_p5)
}
 0x247   :  { %1454 = dma.vmem_to_hbm [thread:$0]  %s1449_s2, 128, %s2028_s4, [#allocation10], %s1812_s25, %s1812_s25, %s1813_s26   ;;  %vm1414_vm4 = vcmask 253952  }
 0x248   :  { %s1818_s4 = smov [#allocation8]  }
 0x249   :  { %s1436_s10 = sshll.u32 %s1818_s4, 4  ;;  %s1437_s10 = int_to_ptr.vmem [resolvable:$true] %s1436_s10 }
 0x24a   :  { %s1780_s11 = scalar_lea.vmem %s1437_s10, 128  ;;  %p1785_p7 = scmp.lt.s32.totalorder %s1437_s10, %s1437_s10 }
 0x24b   :  { %p1781_p6 = scmp.ne.s32.totalorder %s1437_s10, %s1780_s11  ;;  %p1786_p8 = scmp.lt.s32.totalorder %s1780_s11, %s1780_s11 }
 0x24d   :  { %p1787_p9 = por %p1786_p8, %p1785_p7 }
 0x24f   :  { %p1788_p10 = pnand %p1787_p9, %p1781_p6 }
 0x2ec   :  { %v899_v0 = vpop.f32.mrf.mxu0 }
 0x2ed   :  { %1415 = vst.msk [vmem:[#allocation8] sm:$0x1] %vm1414_vm4, %v899_v0 }
 0x2ee   :  { %v1607_v11 = vpop.f32.mrf.mxu0 }
 0x2f0   :  { %v972_v12 = vpop.f32.mrf.mxu1 }
 0x2f1   :  { %1416 = vst.msk [vmem:[#allocation8 + $0x1] sm:$0x1] %vm1414_vm4, %v972_v12 }
 0x2f2   :  { %v1614_v13 = vpop.f32.mrf.mxu1 }
 0x2f4   :  { %v1045_v14 = vpop.f32.mrf.mxu0 }
 0x2f5   :  { %1417 = vst.msk [vmem:[#allocation8 + $0x2] sm:$0x1] %vm1414_vm4, %v1045_v14 }
 0x2f6   :  { %v1621_v15 = vpop.f32.mrf.mxu0 }
 0x2f8   :  { %v1118_v16 = vpop.f32.mrf.mxu1 }
 0x2f9   :  { %1418 = vst.msk [vmem:[#allocation8 + $0x3] sm:$0x1] %vm1414_vm4, %v1118_v16 }
 0x2fa   :  { %v1628_v17 = vpop.f32.mrf.mxu1 }
 0x2fc   :  { %v1264_v18 = vpop.f32.mrf.mxu1 }
 0x2fd   :  { %v1191_v19 = vpop.f32.mrf.mxu0  ;;  %1420 = vst.msk [vmem:[#allocation8 + $0x5] sm:$0x1] %vm1414_vm4, %v1264_v18 }
 0x2fe   :  { %1419 = vst.msk [vmem:[#allocation8 + $0x4] sm:$0x1] %vm1414_vm4, %v1191_v19  ;;  %v1642_v20 = vpop.f32.mrf.mxu1 }
 0x2ff   :  { %v1635_v21 = vpop.f32.mrf.mxu0 }
 0x304   :  { %v1410_v22 = vpop.f32.mrf.mxu1 }
 0x305   :  { %v1337_v23 = vpop.f32.mrf.mxu0  ;;  %1422 = vst.msk [vmem:[#allocation8 + $0x7] sm:$0x1] %vm1414_vm4, %v1410_v22 }
 0x306   :  { %1421 = vst.msk [vmem:[#allocation8 + $0x6] sm:$0x1] %vm1414_vm4, %v1337_v23  ;;  %v1656_v24 = vpop.f32.mrf.mxu1 }
 0x307   :  { %v1649_v25 = vpop.f32.mrf.mxu0 }
 0x308   :  { %1791 = shalt.err (!%p1788_p10)
}
 0x309   :  { %1442 = dma.vmem_to_hbm [thread:$0]  %s1437_s10, 128, %s2027_s3, [#allocation4], %s1812_s25, %s1812_s25, %s1813_s26  }
 0x30a   :  { %1804 = dma.done.wait [#allocation4], 128  }
 0x30b   :  { %1805 = vsyncadd [#allocation4], 4294967168 }
 0x30c   :  { %1806 = dma.done.wait [#allocation10], 128  }
 0x30d   :  { %1807 = vsyncadd [#allocation10], 4294967168 }
 0x30e   :  { %1461 = vsyncpa [#allocation3], 1 }
 0x30f   :  { %1462 = vsyncpa [#allocation6], 1 }
 0x310   :  { %1463 = vsyncpa [#allocation4], 1 }
 0x311   :  { %1464 = vsyncpa [#allocation10], 1 }

</bundles_post_ra>
